<compile_context>
chip_gen: v5e
topology: v5e:2x2
jax: 0.10.0
libtpu: 0.0.40
codegen_flags: <defaults>
</compile_context>

<pallas_src>
import functools

import jax
import jax.numpy as jnp
from jax.experimental import pallas as pl
from jax.experimental.pallas import tpu as pltpu

# ---- module hyper-parameters (consistent with __init__ defaults) ----
NTHETAS = 65
HIDDEN = 32
INPUTS = 3
DEPTH = 3
LATENT = 0          # default; output = softmax over all nthetas columns
PD_TRACK = 0
STDDEV_TRACK = 1
MAG_TRACK = 2
NEG_SLOPE = 0.01    # nn.LeakyReLU default

NPAD = 128          # lane-aligned logits / output width (>= NTHETAS + LATENT)
NEG_BIG = -1e30     # "minus infinity" bias for padded logit columns -> softmax prob 0


def _leaky(v):
    return jnp.where(v >= 0.0, v, NEG_SLOPE * v)


def _cdiv(a, b):
    return -(-a // b)


def _round_up(n, m):
    return ((n + m - 1) // m) * m


def beamnet_kernel(approx_recip,
                   pd_ref,
                   w0_ref, b0_ref,
                   w1_ref, b1_ref,
                   w2_ref, b2_ref,
                   w3_ref, b3_ref,
                   w4_ref, b4_ref,
                   o_ref):
    # pd_ref: (TB, 1) raw phase-difference column (pre-abs, used for the symmetry mask).
    pd = pd_ref[...]
    pd_pos = pd >= 0.0                                  # (TB, 1)
    t = jnp.abs(pd) * (2.0 / jnp.pi)                    # preprocessed pd column, f32

    cd = w1_ref.dtype                                   # elementwise / MXU-input dtype

    # ---- layer 0 (rank-1: mag/stddev columns are zeroed, rx_spacing skipped) ----
    h = _leaky((t * w0_ref[...] + b0_ref[...]).astype(cd))      # (TB, H) in cd

    # ---- hidden layers: cd (bf16 on v6e/v7x) MXU inputs, f32 accumulation,
    #      bias-add + LeakyReLU stay in cd (half the VPU vregs vs f32) ----
    def dense_act(hh, w_ref, b_ref):
        y = jnp.dot(hh, w_ref[...], preferred_element_type=jnp.float32)
        return _leaky(y.astype(cd) + b_ref[...])

    h = dense_act(h, w1_ref, b1_ref)
    h = dense_act(h, w2_ref, b2_ref)
    h = dense_act(h, w3_ref, b3_ref)

    # ---- fused output layer: single (TB,H) x (H, 2*NPAD) matmul.
    # columns [0:65]    -> w4      (forward logits)
    # columns [128:193] -> flip(w4) (flipped logits for the symmetry branch)
    # padded columns    -> zero weights + NEG_BIG bias (softmax prob exactly 0) ----
    logits_both = jnp.dot(h, w4_ref[...],
                          preferred_element_type=jnp.float32) + b4_ref[...]  # (TB, 2*NPAD) f32
    fwd = logits_both[:, :NPAD]
    rev = logits_both[:, NPAD:]

    # symmetry: flipped distribution for rows with negative phase difference.
    # softmax(flip(logits)) == flip(softmax(logits)) -> select BEFORE a single softmax.
    logits = jnp.where(pd_pos, fwd, rev)                # (TB, NPAD) f32

    # ---- softmax over the lane-padded logits (padded cols contribute exactly 0) ----
    m = jnp.max(logits, axis=-1, keepdims=True)
    e = jnp.exp(logits - m)
    s = jnp.sum(e, axis=-1, keepdims=True)
    if approx_recip:
        o_ref[...] = e * pl.reciprocal(s, approx=True)
    else:
        o_ref[...] = e / s


def init_params(key, inputs=INPUTS, hidden=HIDDEN, outputs=NTHETAS + LATENT, depth=DEPTH):
    """Deterministic synthetic weights. Weights stored as (in, out); biases as (1, out)."""
    dims = [(inputs, hidden)] + [(hidden, hidden)] * depth + [(hidden, outputs)]
    params = []
    for (fan_in, fan_out) in dims:
        key, kw, kb = jax.random.split(key, 3)
        scale = 1.0 / jnp.sqrt(jnp.float32(fan_in))
        w = jax.random.normal(kw, (fan_in, fan_out), jnp.float32) * scale
        b = jax.random.normal(kb, (1, fan_out), jnp.float32) * scale
        params.append((w, b))
    return params


@functools.partial(jax.jit,
                   static_argnames=("batch_tile", "matmul_dtype", "approx_recip"))
def beamnet_discrete_forward(x, params, *, batch_tile=2048,
                             matmul_dtype=jnp.bfloat16, approx_recip=True):
    """x: (B, INPUTS) float32 -> (B, NTHETAS) probabilities (flipped for pd<0 rows).

    matmul_dtype=jnp.bfloat16 recommended on v6e/v7x; use jnp.float32 on v5e
    (no native bf16 VALU) or when tighter numerics are needed.
    """
    B = x.shape[0]
    n_out = NTHETAS + LATENT
    assert n_out <= NPAD
    (w0, b0), (w1, b1), (w2, b2), (w3, b3), (w4, b4) = params

    # Only the phase-difference column survives preprocessing -> DMA only that column,
    # and only the pd row of w0 (layer 0 becomes rank-1 inside the kernel).
    pd = x[:, PD_TRACK:PD_TRACK + 1]                    # (B, 1)
    w0_row = w0[PD_TRACK:PD_TRACK + 1, :]               # (1, H), f32

    mm = matmul_dtype
    # Hidden-layer weights AND biases in the compute dtype (keeps bias-add/LeakyReLU in bf16).
    w1c, w2c, w3c = (w.astype(mm) for w in (w1, w2, w3))
    b1c, b2c, b3c = (b.astype(mm) for b in (b1, b2, b3))

    # Fused output layer: [w4 | 0 | flip(w4) | 0], bias [b4 | NEG_BIG | flip(b4) | NEG_BIG].
    w4both = jnp.zeros((HIDDEN, 2 * NPAD), jnp.float32)
    w4both = w4both.at[:, :n_out].set(w4)
    w4both = w4both.at[:, NPAD:NPAD + n_out].set(w4[:, ::-1])
    w4both = w4both.astype(mm)
    b4both = jnp.full((1, 2 * NPAD), NEG_BIG, jnp.float32)
    b4both = b4both.at[:, :n_out].set(b4)
    b4both = b4both.at[:, NPAD:NPAD + n_out].set(b4[:, ::-1])

    # Adaptive batch tile: bounds padding waste (< TB rows total) and keeps >= 2 grid
    # steps when the batch allows it (v7x has 2 TensorCores; batch axis is "parallel").
    n_tiles = max(1, _cdiv(B, int(batch_tile)))
    if n_tiles == 1 and B >= 16:
        n_tiles = 2
    TB = _round_up(_cdiv(B, n_tiles), 8)
    Bp = n_tiles * TB
    if Bp != B:
        pd = jnp.pad(pd, ((0, Bp - B), (0, 0)))         # padded rows: pd=0 -> benign
    grid = (n_tiles,)

    def resident(shape):
        return pl.BlockSpec(shape, lambda i: (0, 0))    # VMEM-resident across grid steps

    weight_args = (w0_row, b0, w1c, b1c, w2c, b2c, w3c, b3c, w4both, b4both)
    weight_bytes = sum(int(a.size) * a.dtype.itemsize for a in weight_args)
    flops = 2 * Bp * (HIDDEN + DEPTH * HIDDEN * HIDDEN + HIDDEN * 2 * NPAD)
    transcendentals = Bp * (NPAD + 1)
    bytes_accessed = Bp * 4 + Bp * NPAD * 4 + weight_bytes

    out = pl.pallas_call(
        functools.partial(beamnet_kernel, approx_recip),
        out_shape=jax.ShapeDtypeStruct((Bp, NPAD), jnp.float32),
        grid=grid,
        in_specs=[
            pl.BlockSpec((TB, 1), lambda i: (i, 0)),              # pd column, tiled over batch
            resident((1, HIDDEN)), resident((1, HIDDEN)),          # w0 pd-row, b0 (f32)
            resident((HIDDEN, HIDDEN)), resident((1, HIDDEN)),     # w1, b1 (cd)
            resident((HIDDEN, HIDDEN)), resident((1, HIDDEN)),     # w2, b2 (cd)
            resident((HIDDEN, HIDDEN)), resident((1, HIDDEN)),     # w3, b3 (cd)
            resident((HIDDEN, 2 * NPAD)), resident((1, 2 * NPAD)), # fused w4/flip(w4), bias
        ],
        out_specs=pl.BlockSpec((TB, NPAD), lambda i: (i, 0)),      # lane-dense 128-col output
        compiler_params=pltpu.CompilerParams(
            dimension_semantics=("parallel",),                     # megacore batch sharding
            vmem_limit_bytes=48 * 1024 * 1024,                     # fits v7x's 64 MiB VMEM
        ),
        cost_estimate=pl.CostEstimate(
            flops=flops,
            transcendentals=transcendentals,
            bytes_accessed=bytes_accessed,
        ),
    )(pd, *weight_args)

    # strip batch padding and the lane padding (columns 65..127 are exactly 0)
    return out[:B, :n_out]


def reference_forward(x, params):
    """Pure-JAX f32 reference mirroring the PyTorch forward, for correctness checking."""
    xv = x.at[:, PD_TRACK].set(jnp.abs(x[:, PD_TRACK]) / (jnp.pi / 2.0))
    xv = xv.at[:, MAG_TRACK].set(0.0)
    xv = xv.at[:, STDDEV_TRACK].set(0.0)
    (w0, b0), (w1, b1), (w2, b2), (w3, b3), (w4, b4) = params
    lk = lambda v: jnp.where(v >= 0.0, v, NEG_SLOPE * v)
    h = lk(xv @ w0 + b0)
    h = lk(h @ w1 + b1)
    h = lk(h @ w2 + b2)
    h = lk(h @ w3 + b3)
    logits = h @ w4 + b4
    p = jax.nn.softmax(logits, axis=1)
    pd_pos_mask = (x[:, PD_TRACK] >= 0.0)[:, None]
    return jnp.where(pd_pos_mask, p, p[:, ::-1])


if __name__ == "__main__":
    key = jax.random.PRNGKey(0)
    kx, kp = jax.random.split(key)

    B = 8
    # phase-difference track in [-pi/2, pi/2]; other tracks arbitrary
    x = jax.random.uniform(kx, (B, INPUTS), jnp.float32, minval=-1.0, maxval=1.0)
    x = x.at[:, PD_TRACK].multiply(jnp.pi / 2.0)
    params = init_params(kp)

    y_ref = reference_forward(x, params)

    # f32-MXU path + exact normalization: tight structural check.
    y32 = jax.block_until_ready(
        beamnet_discrete_forward(x, params, matmul_dtype=jnp.float32,
                                 approx_recip=False))
    assert y32.shape == (B, NTHETAS + LATENT)
    assert jnp.allclose(y32, y_ref, atol=1e-3, rtol=0), "f32 kernel mismatch vs reference"
    assert jnp.allclose(jnp.sum(y32, axis=1), jnp.ones((B,)), atol=1e-3)

    # bf16-MXU + approx-reciprocal path (default, recommended on v6e & v7x).
    y16 = jax.block_until_ready(beamnet_discrete_forward(x, params))
    assert y16.shape == (B, NTHETAS + LATENT)
    assert jnp.allclose(y16, y_ref, atol=1e-2, rtol=0), "bf16 kernel mismatch vs reference"
    assert jnp.allclose(jnp.sum(y16, axis=1), jnp.ones((B,)), atol=5e-3)

    # Exercise multi-step grid + adaptive tile + non-multiple batch / padding path.
    B2 = 50
    x2 = jax.random.uniform(jax.random.PRNGKey(7), (B2, INPUTS), jnp.float32,
                            minval=-1.0, maxval=1.0)
    x2 = x2.at[:, PD_TRACK].multiply(jnp.pi / 2.0)
    y2 = jax.block_until_ready(
        beamnet_discrete_forward(x2, params, batch_tile=16))
    assert y2.shape == (B2, NTHETAS + LATENT)
    assert jnp.allclose(y2, reference_forward(x2, params), atol=1e-2, rtol=0)

    print("KERNEL_OK")
</pallas_src>

<mosaic_0001>
module attributes {stable_mosaic.version = 11 : i64} {
  func.func @beamnet_kernel(%arg0: i32, %arg1: memref<8x1xf32, #tpu.memory_space<vmem>>, %arg2: memref<1x32xf32, #tpu.memory_space<vmem>>, %arg3: memref<1x32xf32, #tpu.memory_space<vmem>>, %arg4: memref<32x32xf32, #tpu.memory_space<vmem>>, %arg5: memref<1x32xf32, #tpu.memory_space<vmem>>, %arg6: memref<32x32xf32, #tpu.memory_space<vmem>>, %arg7: memref<1x32xf32, #tpu.memory_space<vmem>>, %arg8: memref<32x32xf32, #tpu.memory_space<vmem>>, %arg9: memref<1x32xf32, #tpu.memory_space<vmem>>, %arg10: memref<32x256xf32, #tpu.memory_space<vmem>>, %arg11: memref<1x256xf32, #tpu.memory_space<vmem>>, %arg12: memref<8x128xf32, #tpu.memory_space<vmem>>) attributes {dimension_semantics = [#tpu.dimension_semantics<parallel>], iteration_bounds = array<i64: 1>, scalar_prefetch = 0 : i64, scratch_operands = 0 : i64, tpu.core_type = #tpu.core_type<tc>, window_params = [{transform_indices = @transform_0, window_bounds = array<i64: 8, 1>}, {pipeline_mode = #tpu.pipeline_mode<synchronous>, transform_indices = @transform_1, window_bounds = array<i64: 1, 32>}, {pipeline_mode = #tpu.pipeline_mode<synchronous>, transform_indices = @transform_2, window_bounds = array<i64: 1, 32>}, {pipeline_mode = #tpu.pipeline_mode<synchronous>, transform_indices = @transform_3, window_bounds = array<i64: 32, 32>}, {pipeline_mode = #tpu.pipeline_mode<synchronous>, transform_indices = @transform_4, window_bounds = array<i64: 1, 32>}, {pipeline_mode = #tpu.pipeline_mode<synchronous>, transform_indices = @transform_5, window_bounds = array<i64: 32, 32>}, {pipeline_mode = #tpu.pipeline_mode<synchronous>, transform_indices = @transform_6, window_bounds = array<i64: 1, 32>}, {pipeline_mode = #tpu.pipeline_mode<synchronous>, transform_indices = @transform_7, window_bounds = array<i64: 32, 32>}, {pipeline_mode = #tpu.pipeline_mode<synchronous>, transform_indices = @transform_8, window_bounds = array<i64: 1, 32>}, {pipeline_mode = #tpu.pipeline_mode<synchronous>, transform_indices = @transform_9, window_bounds = array<i64: 32, 256>}, {pipeline_mode = #tpu.pipeline_mode<synchronous>, transform_indices = @transform_10, window_bounds = array<i64: 1, 256>}, {transform_indices = @transform_11, window_bounds = array<i64: 8, 128>}]} {
    %c0 = arith.constant 0 : index
    %c0_0 = arith.constant 0 : index
    %0 = vector.load %arg1[%c0, %c0_0] : memref<8x1xf32, #tpu.memory_space<vmem>>, vector<8x1xf32>
    %cst = arith.constant 0.000000e+00 : f32
    %1 = vector.broadcast %cst : f32 to vector<8x1xf32>
    %2 = arith.cmpf oge, %0, %1 : vector<8x1xf32>
    %3 = math.absf %0 : vector<8x1xf32>
    %cst_1 = arith.constant 0.636619746 : f32
    %4 = vector.broadcast %cst_1 : f32 to vector<8x1xf32>
    %5 = arith.mulf %3, %4 : vector<8x1xf32>
    %c0_2 = arith.constant 0 : index
    %c0_3 = arith.constant 0 : index
    %6 = vector.load %arg2[%c0_2, %c0_3] : memref<1x32xf32, #tpu.memory_space<vmem>>, vector<1x32xf32>
    %7 = vector.broadcast %5 : vector<8x1xf32> to vector<8x32xf32>
    %8 = vector.broadcast %6 : vector<1x32xf32> to vector<8x32xf32>
    %9 = arith.mulf %7, %8 : vector<8x32xf32>
    %c0_4 = arith.constant 0 : index
    %c0_5 = arith.constant 0 : index
    %10 = vector.load %arg3[%c0_4, %c0_5] : memref<1x32xf32, #tpu.memory_space<vmem>>, vector<1x32xf32>
    %11 = vector.broadcast %10 : vector<1x32xf32> to vector<8x32xf32>
    %12 = arith.addf %9, %11 : vector<8x32xf32>
    %cst_6 = arith.constant 0.000000e+00 : f32
    %13 = vector.broadcast %cst_6 : f32 to vector<8x32xf32>
    %14 = arith.cmpf oge, %12, %13 : vector<8x32xf32>
    %cst_7 = arith.constant 0.00999999977 : f32
    %15 = vector.broadcast %cst_7 : f32 to vector<8x32xf32>
    %16 = arith.mulf %15, %12 : vector<8x32xf32>
    %17 = arith.select %14, %12, %16 : vector<8x32xi1>, vector<8x32xf32>
    %c0_8 = arith.constant 0 : index
    %c0_9 = arith.constant 0 : index
    %18 = vector.load %arg4[%c0_8, %c0_9] : memref<32x32xf32, #tpu.memory_space<vmem>>, vector<32x32xf32>
    %cst_10 = arith.constant dense<0.000000e+00> : vector<8x32xf32>
    %19 = tpu.matmul %17, %18, %cst_10 {dimension_numbers = #tpu.dot_dimension_numbers<[1], [0], [0], [1], [0, 0, 1, 1], [], []>} : vector<8x32xf32>, vector<32x32xf32>, vector<8x32xf32> -> vector<8x32xf32>
    %c0_11 = arith.constant 0 : index
    %c0_12 = arith.constant 0 : index
    %20 = vector.load %arg5[%c0_11, %c0_12] : memref<1x32xf32, #tpu.memory_space<vmem>>, vector<1x32xf32>
    %21 = vector.broadcast %20 : vector<1x32xf32> to vector<8x32xf32>
    %22 = arith.addf %19, %21 : vector<8x32xf32>
    %cst_13 = arith.constant 0.000000e+00 : f32
    %23 = vector.broadcast %cst_13 : f32 to vector<8x32xf32>
    %24 = arith.cmpf oge, %22, %23 : vector<8x32xf32>
    %cst_14 = arith.constant 0.00999999977 : f32
    %25 = vector.broadcast %cst_14 : f32 to vector<8x32xf32>
    %26 = arith.mulf %25, %22 : vector<8x32xf32>
    %27 = arith.select %24, %22, %26 : vector<8x32xi1>, vector<8x32xf32>
    %c0_15 = arith.constant 0 : index
    %c0_16 = arith.constant 0 : index
    %28 = vector.load %arg6[%c0_15, %c0_16] : memref<32x32xf32, #tpu.memory_space<vmem>>, vector<32x32xf32>
    %cst_17 = arith.constant dense<0.000000e+00> : vector<8x32xf32>
    %29 = tpu.matmul %27, %28, %cst_17 {dimension_numbers = #tpu.dot_dimension_numbers<[1], [0], [0], [1], [0, 0, 1, 1], [], []>} : vector<8x32xf32>, vector<32x32xf32>, vector<8x32xf32> -> vector<8x32xf32>
    %c0_18 = arith.constant 0 : index
    %c0_19 = arith.constant 0 : index
    %30 = vector.load %arg7[%c0_18, %c0_19] : memref<1x32xf32, #tpu.memory_space<vmem>>, vector<1x32xf32>
    %31 = vector.broadcast %30 : vector<1x32xf32> to vector<8x32xf32>
    %32 = arith.addf %29, %31 : vector<8x32xf32>
    %cst_20 = arith.constant 0.000000e+00 : f32
    %33 = vector.broadcast %cst_20 : f32 to vector<8x32xf32>
    %34 = arith.cmpf oge, %32, %33 : vector<8x32xf32>
    %cst_21 = arith.constant 0.00999999977 : f32
    %35 = vector.broadcast %cst_21 : f32 to vector<8x32xf32>
    %36 = arith.mulf %35, %32 : vector<8x32xf32>
    %37 = arith.select %34, %32, %36 : vector<8x32xi1>, vector<8x32xf32>
    %c0_22 = arith.constant 0 : index
    %c0_23 = arith.constant 0 : index
    %38 = vector.load %arg8[%c0_22, %c0_23] : memref<32x32xf32, #tpu.memory_space<vmem>>, vector<32x32xf32>
    %cst_24 = arith.constant dense<0.000000e+00> : vector<8x32xf32>
    %39 = tpu.matmul %37, %38, %cst_24 {dimension_numbers = #tpu.dot_dimension_numbers<[1], [0], [0], [1], [0, 0, 1, 1], [], []>} : vector<8x32xf32>, vector<32x32xf32>, vector<8x32xf32> -> vector<8x32xf32>
    %c0_25 = arith.constant 0 : index
    %c0_26 = arith.constant 0 : index
    %40 = vector.load %arg9[%c0_25, %c0_26] : memref<1x32xf32, #tpu.memory_space<vmem>>, vector<1x32xf32>
    %41 = vector.broadcast %40 : vector<1x32xf32> to vector<8x32xf32>
    %42 = arith.addf %39, %41 : vector<8x32xf32>
    %cst_27 = arith.constant 0.000000e+00 : f32
    %43 = vector.broadcast %cst_27 : f32 to vector<8x32xf32>
    %44 = arith.cmpf oge, %42, %43 : vector<8x32xf32>
    %cst_28 = arith.constant 0.00999999977 : f32
    %45 = vector.broadcast %cst_28 : f32 to vector<8x32xf32>
    %46 = arith.mulf %45, %42 : vector<8x32xf32>
    %47 = arith.select %44, %42, %46 : vector<8x32xi1>, vector<8x32xf32>
    %c0_29 = arith.constant 0 : index
    %c0_30 = arith.constant 0 : index
    %48 = vector.load %arg10[%c0_29, %c0_30] : memref<32x256xf32, #tpu.memory_space<vmem>>, vector<32x256xf32>
    %cst_31 = arith.constant dense<0.000000e+00> : vector<8x256xf32>
    %49 = tpu.matmul %47, %48, %cst_31 {dimension_numbers = #tpu.dot_dimension_numbers<[1], [0], [0], [1], [0, 0, 1, 1], [], []>} : vector<8x32xf32>, vector<32x256xf32>, vector<8x256xf32> -> vector<8x256xf32>
    %c0_32 = arith.constant 0 : index
    %c0_33 = arith.constant 0 : index
    %50 = vector.load %arg11[%c0_32, %c0_33] : memref<1x256xf32, #tpu.memory_space<vmem>>, vector<1x256xf32>
    %51 = vector.broadcast %50 : vector<1x256xf32> to vector<8x256xf32>
    %52 = arith.addf %49, %51 : vector<8x256xf32>
    %53 = vector.extract_strided_slice %52 {offsets = [0, 0], sizes = [8, 128], strides = [1, 1]} : vector<8x256xf32> to vector<8x128xf32>
    %54 = vector.extract_strided_slice %52 {offsets = [0, 128], sizes = [8, 128], strides = [1, 1]} : vector<8x256xf32> to vector<8x128xf32>
    %55 = vector.shape_cast %2 : vector<8x1xi1> to vector<8x1xi1>
    %56 = vector.broadcast %55 : vector<8x1xi1> to vector<8x128xi1>
    %57 = arith.select %56, %53, %54 : vector<8x128xi1>, vector<8x128xf32>
    %cst_34 = arith.constant dense<0xFF800000> : vector<8xf32>
    %58 = vector.multi_reduction <maximumf>, %57, %cst_34 [1] : vector<8x128xf32> to vector<8xf32>
    %59 = vector.shape_cast %58 : vector<8xf32> to vector<8x1xf32>
    %60 = vector.broadcast %59 : vector<8x1xf32> to vector<8x128xf32>
    %61 = arith.subf %57, %60 : vector<8x128xf32>
    %62 = math.exp %61 : vector<8x128xf32>
    %cst_35 = arith.constant dense<0.000000e+00> : vector<8xf32>
    %63 = vector.multi_reduction <add>, %62, %cst_35 [1] : vector<8x128xf32> to vector<8xf32>
    %64 = vector.shape_cast %63 : vector<8xf32> to vector<8x1xf32>
    %65 = vector.broadcast %64 : vector<8x1xf32> to vector<8x128xf32>
    %66 = arith.divf %62, %65 : vector<8x128xf32>
    %c0_36 = arith.constant 0 : index
    %c0_37 = arith.constant 0 : index
    %67 = vector.load %arg12[%c0_36, %c0_37] : memref<8x128xf32, #tpu.memory_space<vmem>>, vector<8x128xf32>
    tpu.vector_store %arg12[%c0_36, %c0_37], %66 {strides = array<i32>} : memref<8x128xf32, #tpu.memory_space<vmem>>, vector<8x128xf32>,
    return
  }
  func.func @transform_0(%arg0: i32) -> (i32, i32) {
    %c0_i32 = arith.constant 0 : i32
    %c0_i32_0 = arith.constant 0 : i32
    return %arg0, %c0_i32 : i32, i32
  }
  func.func @transform_1(%arg0: i32) -> (i32, i32) {
    %c0_i32 = arith.constant 0 : i32
    %c0_i32_0 = arith.constant 0 : i32
    %c0_i32_1 = arith.constant 0 : i32
    return %c0_i32, %c0_i32_0 : i32, i32
  }
  func.func @transform_2(%arg0: i32) -> (i32, i32) {
    %c0_i32 = arith.constant 0 : i32
    %c0_i32_0 = arith.constant 0 : i32
    %c0_i32_1 = arith.constant 0 : i32
    return %c0_i32, %c0_i32_0 : i32, i32
  }
  func.func @transform_3(%arg0: i32) -> (i32, i32) {
    %c0_i32 = arith.constant 0 : i32
    %c0_i32_0 = arith.constant 0 : i32
    %c0_i32_1 = arith.constant 0 : i32
    return %c0_i32, %c0_i32_0 : i32, i32
  }
  func.func @transform_4(%arg0: i32) -> (i32, i32) {
    %c0_i32 = arith.constant 0 : i32
    %c0_i32_0 = arith.constant 0 : i32
    %c0_i32_1 = arith.constant 0 : i32
    return %c0_i32, %c0_i32_0 : i32, i32
  }
  func.func @transform_5(%arg0: i32) -> (i32, i32) {
    %c0_i32 = arith.constant 0 : i32
    %c0_i32_0 = arith.constant 0 : i32
    %c0_i32_1 = arith.constant 0 : i32
    return %c0_i32, %c0_i32_0 : i32, i32
  }
  func.func @transform_6(%arg0: i32) -> (i32, i32) {
    %c0_i32 = arith.constant 0 : i32
    %c0_i32_0 = arith.constant 0 : i32
    %c0_i32_1 = arith.constant 0 : i32
    return %c0_i32, %c0_i32_0 : i32, i32
  }
  func.func @transform_7(%arg0: i32) -> (i32, i32) {
    %c0_i32 = arith.constant 0 : i32
    %c0_i32_0 = arith.constant 0 : i32
    %c0_i32_1 = arith.constant 0 : i32
    return %c0_i32, %c0_i32_0 : i32, i32
  }
  func.func @transform_8(%arg0: i32) -> (i32, i32) {
    %c0_i32 = arith.constant 0 : i32
    %c0_i32_0 = arith.constant 0 : i32
    %c0_i32_1 = arith.constant 0 : i32
    return %c0_i32, %c0_i32_0 : i32, i32
  }
  func.func @transform_9(%arg0: i32) -> (i32, i32) {
    %c0_i32 = arith.constant 0 : i32
    %c0_i32_0 = arith.constant 0 : i32
    %c0_i32_1 = arith.constant 0 : i32
    return %c0_i32, %c0_i32_0 : i32, i32
  }
  func.func @transform_10(%arg0: i32) -> (i32, i32) {
    %c0_i32 = arith.constant 0 : i32
    %c0_i32_0 = arith.constant 0 : i32
    %c0_i32_1 = arith.constant 0 : i32
    return %c0_i32, %c0_i32_0 : i32, i32
  }
  func.func @transform_11(%arg0: i32) -> (i32, i32) {
    %c0_i32 = arith.constant 0 : i32
    %c0_i32_0 = arith.constant 0 : i32
    return %arg0, %c0_i32 : i32, i32
  }
}

</mosaic_0001>

<bundles_post_ra>
// kernel: beamnet_discrete_forward.1
= control target key start
LH: loop header
LB: loop body
LE: loop exit
PB: predicated region body
PF: predicated region fallthrough
CT: control target
= control target key end

     0   :  { %v309_v1 = vmov 0   ;;  %s460_s0 = inlined_call_operand.vmem [shape: f32[8,1], index: 0, kind: input, shape index: {}]   ;;  %s461_s1 = inlined_call_operand.vmem [shape: f32[1,32], index: 1, kind: input, shape index: {}]   ;;  %s462_s2 = inlined_call_operand.vmem [shape: f32[1,32], index: 2, kind: input, shape index: {}]   ;;  %s463_s3 = inlined_call_operand.vmem [shape: f32[32,32], index: 3, kind: input, shape index: {}]   ;;  %s464_s4 = inlined_call_operand.vmem [shape: f32[1,32], index: 4, kind: input, shape index: {}]   ;;  %s465_s5 = inlined_call_operand.vmem [shape: f32[32,32], index: 5, kind: input, shape index: {}]   ;;  %s466_s6 = inlined_call_operand.vmem [shape: f32[1,32], index: 6, kind: input, shape index: {}]   ;;  %s467_s7 = inlined_call_operand.vmem [shape: f32[32,32], index: 7, kind: input, shape index: {}]   ;;  %s468_s8 = inlined_call_operand.vmem [shape: f32[1,32], index: 8, kind: input, shape index: {}]   ;;  %s469_s9 = inlined_call_operand.vmem [shape: f32[32,256], index: 9, kind: input, shape index: {}]   ;;  %s470_s10 = inlined_call_operand.vmem [shape: f32[1,256], index: 10, kind: input, shape index: {}]   ;;  %s471_s11 = inlined_call_operand.hbm [shape: f32[8,128], index: 11, kind: output, shape index: {}]  }
   0x1   :  { %v39_v0 = vld [vmem:[%s460_s0] sm:$0xff]  ;;  %273 = vset.pattern.permute.xlu0 %v309_v1 }
   0x2   :  { %v41_v2 = vand.u32 2147483647, %v39_v0 }
   0x4   :  { %v42_v3 = vmul.f32 0.63661975, %v41_v2 }
   0x5   :  { %16 = vsyncpa [#allocation3], 0  ;;  %vm40_vm0 = vcmp.ge.f32.partialorder %v39_v0, 0.0  ;;  %v64_v5 = vld [vmem:[%s463_s3 + $0x18] sm:$0xff]  ;;  %v63_v6 = vld [vmem:[%s463_s3 + $0x10] sm:$0xff]  ;;  %vm69_vm2 = vcmask 261120  }
   0x6   :  { %46 = vperm.xlu0 %273, %v42_v3   ;;  %v221_v4 = vsel %vm40_vm0, 1, %v309_v1  ;;  %85 = vmatpush.msra.mxu0 %v64_v5  ;;  %v62_v7 = vld [vmem:[%s463_s3 + $0x8] sm:$0xff]  ;;  %v61_v8 = vld [vmem:[%s463_s3] sm:$0xff]  ;;  %v99_v9 = vld [vmem:[%s465_s5 + $0x18] sm:$0xff] }
   0x7   :  { %119 = vmatpush.msra.mxu1 %v99_v9  ;;  %v274_v10 = vld [vmem:[%s461_s1] ss:$0 sm:$0xff]  ;;  %v98_v17 = vld [vmem:[%s465_s5 + $0x10] sm:$0xff]  ;;  %v97_v18 = vld [vmem:[%s465_s5 + $0x8] sm:$0xff] }
   0x8   :  { %86 = vmatpush.msra.mxu0 %v63_v6  ;;  %v275_v11 = vld [vmem:[%s462_s2] ss:$0 sm:$0xff]  ;;  %v133_v20 = vld [vmem:[%s467_s7 + $0x18] sm:$0xff]  ;;  %v132_v26 = vld [vmem:[%s467_s7 + $0x10] sm:$0xff] }
   0x9   :  { %120 = vmatpush.msra.mxu1 %v98_v17  ;;  %v96_v19 = vld [vmem:[%s465_s5] sm:$0xff]  ;;  %153 = vmatpush.msra.mxu2 %v133_v20  ;;  %v131_v27 = vld [vmem:[%s467_s7 + $0x8] sm:$0xff]  ;;  %v170_v29 = vld [vmem:[%s469_s9 + $0x30] sm:$0xff]  ;;  %s257_s5 = sshll.u32 %s471_s11, 4  ;;  %s258_s5 = int_to_ptr.hbm [resolvable:$true] %s257_s5 }
   0xa   :  { %87 = vmatpush.msra.mxu0 %v62_v7  ;;  %v276_v21 = vld [vmem:[%s464_s4] ss:$0 sm:$0xff]  ;;  %v171_v30 = vld [vmem:[%s469_s9 + $0x38] sm:$0xff]  ;;  %193 = vmatpush.msra.mxu3 %v170_v29  ;;  %v169_v37 = vld [vmem:[%s469_s9 + $0x28] sm:$0xff] }
   0xb   :  { %121 = vmatpush.msra.mxu1 %v97_v18  ;;  %154 = vmatpush.msra.mxu2 %v132_v26  ;;  %v130_v28 = vld [vmem:[%s467_s7] sm:$0xff]  ;;  %v166_v38 = vld [vmem:[%s469_s9 + $0x10] sm:$0xff]  ;;  %v167_v39 = vld [vmem:[%s469_s9 + $0x18] sm:$0xff] }
   0xc   :  { %88 = vmatpush.msra.mxu0 %v61_v8  ;;  %v277_v31 = vld [vmem:[%s466_s6] ss:$0 sm:$0xff]  ;;  %v165_v41 = vld [vmem:[%s469_s9 + $0x8] sm:$0xff] }
   0xd   :  { %122 = vmatpush.msra.mxu1 %v96_v19  ;;  %155 = vmatpush.msra.mxu2 %v131_v27  ;;  %v168_v36 = vld [vmem:[%s469_s9 + $0x20] sm:$0xff] }
   0xe   :  { %223 = vperm.xlu0 %273, %v221_v4   ;;  %213 = vmatpush.msrb.mxu0 %v171_v30  ;;  %v164_v40 = vld [vmem:[%s469_s9] sm:$0xff] }
   0xf   :  { %156 = vmatpush.msra.mxu2 %v130_v28  ;;  %194 = vmatpush.msra.mxu3 %v168_v36  ;;  %v278_v42 = vld [vmem:[%s468_s8] ss:$0 sm:$0xff]  ;;  %s310_s8 = smov [#allocation2]  }
  0x10   :  { %214 = vmatpush.msrb.mxu0 %v169_v37  ;;  %v172_v47 = vld [vmem:[%s470_s10] sm:$0x3]  ;;  %s255_s9 = sshll.u32 %s310_s8, 4  ;;  %s256_s9 = int_to_ptr.vmem [resolvable:$true] %s255_s9 }
  0x11   :  { %195 = vmatpush.msra.mxu3 %v166_v38  ;;  %v175_v48 = vperm.slane %v172_v47, 1  ;;  %v174_v49 = vperm.slane %v172_v47, 0 }
  0x12   :  { %215 = vmatpush.msrb.mxu0 %v167_v39 }
  0x13   :  { %196 = vmatpush.msra.mxu3 %v164_v40 }
  0x14   :  { %216 = vmatpush.msrb.mxu0 %v165_v41 }
  0x78   :  { %v47_v12 = vpop.permute.xlu0 %46 }
  0x79   :  { %v52_v13 = vmul.f32 %v274_v10, %v47_v12 }
  0x7b   :  { %v57_v14 = vadd.f32 %v275_v11, %v52_v13 }
  0x7d   :  { %vm58_vm1 = vcmp.ge.f32.partialorder %v57_v14, 0.0  ;;  %v59_v15 = vmul.f32 0.01, %v57_v14 }
  0x7f   :  { %v60_v16 = vsel %vm58_vm1, %v57_v14, %v59_v15 }
  0x80   :  { %266 = vmatmul.msk.f32.vlgmr.msra.gmra.mxu0 %vm69_vm2, %v60_v16  ;;  %v224_v51 = vpop.permute.xlu0 %223 }
  0x81   :  { %vm225_vm6 = vcmp.eq.s32.totalorder %v224_v51, 1 }
  0xfd   :  { %v90_v22 = vpop.f32.mrf.mxu0 }
  0xfe   :  { %v91_v23 = vadd.f32 %v276_v21, %v90_v22 }
 0x100   :  { %v94_v24 = vmul.f32 0.01, %v91_v23  ;;  %vm93_vm3 = vcmp.ge.f32.partialorder %v91_v23, 0.0 }
 0x102   :  { %v95_v25 = vsel %vm93_vm3, %v91_v23, %v94_v24 }
 0x103   :  { %267 = vmatmul.msk.f32.vlgmr.msra.gmra.mxu1 %vm69_vm2, %v95_v25 }
 0x180   :  { %v124_v32 = vpop.f32.mrf.mxu1 }
 0x181   :  { %v125_v33 = vadd.f32 %v277_v31, %v124_v32 }
 0x183   :  { %v128_v34 = vmul.f32 0.01, %v125_v33  ;;  %vm127_vm4 = vcmp.ge.f32.partialorder %v125_v33, 0.0 }
 0x185   :  { %v129_v35 = vsel %vm127_vm4, %v125_v33, %v128_v34 }
 0x186   :  { %268 = vmatmul.msk.f32.vlgmr.msra.gmra.mxu2 %vm69_vm2, %v129_v35 }
 0x209   :  { %v158_v43 = vpop.f32.mrf.mxu2 }
 0x20a   :  { %v159_v44 = vadd.f32 %v278_v42, %v158_v43 }
 0x20c   :  { %v162_v45 = vmul.f32 0.01, %v159_v44  ;;  %vm161_vm5 = vcmp.ge.f32.partialorder %v159_v44, 0.0 }
 0x20e   :  { %v163_v46 = vsel %vm161_vm5, %v159_v44, %v162_v45 }
 0x20f   :  { %269 = vmatmul.msk.f32.vlgmr.msra.gmra.mxu3 %vm69_vm2, %v163_v46  ;;  %270 = vmatmul.msk.f32.vlgmr.msrb.gmra.mxu0 %vm69_vm2, %v163_v46 }
 0x28c   :  { %v218_v50 = vpop.f32.mrf.mxu0 }
 0x28d   :  { %v219_v53 = vadd.f32 %v218_v50, %v175_v48 }
 0x292   :  { %v198_v52 = vpop.f32.mrf.mxu3 }
 0x293   :  { %v199_v54 = vadd.f32 %v198_v52, %v174_v49 }
 0x295   :  { %v226_v55 = vsel %vm225_vm6, %v199_v54, %v219_v53 }
 0x296   :  { %227 = vmax.xlane.f32.xlu1 %v226_v55 }
 0x309   :  { %v228_v56 = vpop.xlane.xlu1 %227 }
 0x30a   :  { %v229_v57 = vsub.f32 %v226_v55, %v228_v56 }
 0x30c   :  { %v230_v58 = vmul.f32 1.442695, %v229_v57 }
 0x30e   :  { %279 = vpow2.f32 %v230_v58 }
 0x314   :  { %v280_v59 = vpop.eup %279 }
 0x315   :  { %232 = vadd.xlane.f32.xlu1 %v280_v59 }
 0x388   :  { %v233_v60 = vpop.xlane.xlu1 %232 }
 0x389   :  { %281 = vrcp.f32 %v233_v60  ;;  %v245_v0 = vand.u32 2147483648, %v233_v60  ;;  %v243_v2 = vand.u32 2147483647, %v233_v60  ;;  %vm239_vm8 = vweird.f32 %v233_v60 }
 0x38b   :  { %v246_v4 = vor.u32 1.1754944e-38, %v245_v0  ;;  %vm244_vm10 = vcmp.eq.f32.partialorder %v243_v2, 8.507059e+37 }
 0x38f   :  { %v282_v61 = vpop.eup %281 }
 0x390   :  { %v235_v62 = vmul.f32 %v282_v61, %v233_v60  ;;  %vm240_vm7 = vweird.f32 %v282_v61 }
 0x391   :  { %vm241_vm9 = vmor %vm239_vm8, %vm240_vm7 }
 0x392   :  { %v236_v63 = vsub.f32 1.0, %v235_v62 }
 0x394   :  { %v237_v1 = vmul.f32 %v282_v61, %v236_v63 }
 0x396   :  { %v238_v3 = vadd.f32 %v282_v61, %v237_v1 }
 0x398   :  { %v242_v5 = vsel %vm241_vm9, %v282_v61, %v238_v3 }
 0x399   :  { %v247_v6 = vsel %vm244_vm10, %v246_v4, %v242_v5 }
 0x39a   :  { %v248_v7 = vmul.f32 %v280_v59, %v247_v6 }
 0x39c   :  { %249 = vst [vmem:[#allocation2] sm:$0xff] %v248_v7 }
 0x39d   :  { %260 = dma.vmem_to_hbm [thread:$0]  %s256_s9, 128, %s258_s5, [#allocation3]  }
 0x39e   :  { %307 = dma.done.wait [#allocation3], 128  }
 0x39f   :  { %308 = vsyncadd [#allocation3], 4294967168 }
 0x3a0   :  { %265 = vsyncpa [#allocation3], 1 }

</bundles_post_ra>
